<compile_context>
chip_gen: v7x
topology: tpu7x:2x2x1
jax: 0.10.0
libtpu: 0.0.40
codegen_flags: <defaults>
</compile_context>

<pallas_src>
import jax
import jax.numpy as jnp
from jax.experimental import pallas as pl
from jax.experimental.pallas import tpu as pltpu

PACK = 8  # rows packed per lane-dense row (S=16 -> 128 lanes)


def _dynamics_kernel(state_ref, action_ref, c_ref, d_ref, out_ref):
    # Fused affine update on packed rows: out = state @ C_hat + action @ D_hat
    # (two MXU dots, f32 accumulation, no epilogue, unmasked 128-lane stores).
    acc = jnp.dot(state_ref[...], c_ref[...], preferred_element_type=jnp.float32)
    acc = acc + jnp.dot(action_ref[...], d_ref[...], preferred_element_type=jnp.float32)
    out_ref[...] = acc.astype(out_ref.dtype)


def _fold_weights(A, B, dt, integration_scheme):
    """Fold dt + integration scheme into fused weights C, D so that
    forward(state, action) == state @ C + action @ D  (all f32)."""
    A = jnp.asarray(A, jnp.float32)
    B = jnp.asarray(B, jnp.float32)
    S = A.shape[0]
    I = jnp.eye(S, dtype=jnp.float32)
    M = I + dt * A.T          # (S, S): tmp = state @ M + action @ Nw
    Nw = dt * B.T             # (Adim, S)
    if integration_scheme == "euler":
        return M, Nw
    # Symplectic: vel = tmp[:, p:], pos = state[:, :p] + dt * vel
    assert S % 2 == 0
    p = S // 2
    C = jnp.concatenate([I[:, :p] + dt * M[:, p:], M[:, p:]], axis=1)   # (S, S)
    D = jnp.concatenate([dt * Nw[:, p:], Nw[:, p:]], axis=1)            # (Adim, S)
    return C, D


def dynamics_forward(state, action, A, B, *, dt=0.01,
                     integration_scheme="symplectic", block_rows=1024):
    """One forward step of DynamicsModel (linear dynamics).

    state: (N, S), action: (N, Adim).  block_rows is the row-tile size in
    *packed* rows (each packed row = PACK original rows, 128 lanes wide).
    """
    N, S = state.shape
    _, Adim = action.shape
    assert S * PACK == 128, "packing factor tuned for S=16 -> 128 lanes"

    # --- wrapper-side weight fusion + lane-dense block-diagonal packing -----
    C, D = _fold_weights(A, B, dt, integration_scheme)       # f32, keep f32
    eye_p = jnp.eye(PACK, dtype=jnp.float32)
    C_hat = jnp.kron(eye_p, C)                                # (128, 128) f32
    D_hat = jnp.kron(eye_p, D)                                # (PACK*Adim, 128) f32

    # Pack 8 rows per 128-lane row (free row-major metadata reshape).
    rem = N % PACK
    if rem:
        # Only <= PACK-1 rows of padding (rare ragged case); the bm-multiple
        # padding pass over the whole input from the previous version is gone.
        pad = PACK - rem
        state = jnp.pad(state, ((0, pad), (0, 0)))
        action = jnp.pad(action, ((0, pad), (0, 0)))
    P = state.shape[0] // PACK
    state_p = state.reshape(P, PACK * S)                      # (P, 128)
    action_p = action.reshape(P, PACK * Adim)                 # (P, 64)

    # --- row-tile sizing: MB-class tiles, ragged last tile left to Pallas ----
    if P >= 8:
        bm = max(8, (min(int(block_rows), P) // 8) * 8)
        # Keep >= ~4 tiles for v7x's two TensorCores when tiles stay MB-class.
        if P >= 4 * 512:
            bm = min(bm, max(512, ((pl.cdiv(P, 4) + 7) // 8) * 8))
    else:
        bm = P                                                # full-extent block
    grid = (pl.cdiv(P, bm),)

    # --- explicit VMEM budget (packed widths; headroom under v7x's 64 MiB) ---
    itemsize = jnp.dtype(state.dtype).itemsize
    tile_bytes = bm * (PACK * S + PACK * Adim) * itemsize + bm * PACK * S * 4
    weight_bytes = (128 * 128 + PACK * Adim * 128) * 4
    vmem_limit = int(2 * tile_bytes + 2 * weight_bytes + (2 << 20))
    vmem_limit = min(max(vmem_limit, 4 << 20), 48 << 20)

    cost = pl.CostEstimate(
        flops=2 * P * (PACK * S + PACK * Adim) * (PACK * S),
        transcendentals=0,
        bytes_accessed=(P * (PACK * S + PACK * Adim) * itemsize
                        + P * PACK * S * itemsize
                        + weight_bytes),
    )

    out_p = pl.pallas_call(
        _dynamics_kernel,
        out_shape=jax.ShapeDtypeStruct((P, PACK * S), state.dtype),
        grid_spec=pltpu.PrefetchScalarGridSpec(
            num_scalar_prefetch=0,
            grid=grid,
            in_specs=[
                pl.BlockSpec((bm, PACK * S), lambda i: (i, 0)),      # packed state
                pl.BlockSpec((bm, PACK * Adim), lambda i: (i, 0)),   # packed action
                pl.BlockSpec((PACK * S, PACK * S), lambda i: (0, 0)),    # C_hat (resident)
                pl.BlockSpec((PACK * Adim, PACK * S), lambda i: (0, 0)), # D_hat (resident)
            ],
            out_specs=pl.BlockSpec((bm, PACK * S), lambda i: (i, 0)),
        ),
        compiler_params=pltpu.CompilerParams(
            dimension_semantics=("parallel",),
            vmem_limit_bytes=vmem_limit,
        ),
        cost_estimate=cost,
    )(state_p, action_p, C_hat, D_hat)

    out = out_p.reshape(P * PACK, S)
    return out[:N] if rem else out


def dynamics_forward_ref(state, action, A, B, *, dt=0.01,
                         integration_scheme="symplectic"):
    """Pure-JAX reference mirroring the PyTorch forward."""
    deriv = state @ A.T + action @ B.T
    new_state = state + deriv * dt
    if integration_scheme == "euler":
        return new_state
    p = state.shape[1] // 2
    vel = new_state[:, p:]
    pos = state[:, :p] + vel * dt
    return jnp.concatenate([pos, vel], axis=1)


if __name__ == "__main__":
    key = jax.random.PRNGKey(0)
    k1, k2, k3, k4 = jax.random.split(key, 4)

    batch = 256          # rows; packed into 32 lane-dense rows -> 1 grid step
    state_size = 16      # even, so p = 8
    action_size = 8
    dt = 0.01

    state = jax.random.normal(k1, (batch, state_size), dtype=jnp.float32)
    action = jax.random.normal(k2, (batch, action_size), dtype=jnp.float32)
    # Deterministic synthetic dynamics parameters.
    A = 0.1 * jax.random.normal(k3, (state_size, state_size), dtype=jnp.float32)
    B = 0.1 * jax.random.normal(k4, (state_size, action_size), dtype=jnp.float32)

    out = dynamics_forward(state, action, A, B, dt=dt)
    out = jax.block_until_ready(out)

    ref = dynamics_forward_ref(state, action, A, B, dt=dt)
    assert out.shape == (batch, state_size)
    assert jnp.allclose(out, ref, atol=1e-5, rtol=1e-5), "mismatch vs reference"

    # Also exercise euler and a ragged (N % 8 != 0) batch path.
    out_e = jax.block_until_ready(
        dynamics_forward(state[:251], action[:251], A, B, dt=dt,
                         integration_scheme="euler"))
    ref_e = dynamics_forward_ref(state[:251], action[:251], A, B, dt=dt,
                                 integration_scheme="euler")
    assert jnp.allclose(out_e, ref_e, atol=1e-5, rtol=1e-5), "euler mismatch"

    print("KERNEL_OK")
</pallas_src>

<mosaic_0001>
module attributes {stable_mosaic.version = 11 : i64} {
  func.func @_dynamics_kernel(%arg0: i32, %arg1: memref<32x128xf32, #tpu.memory_space<vmem>>, %arg2: memref<32x64xf32, #tpu.memory_space<vmem>>, %arg3: memref<128x128xf32, #tpu.memory_space<vmem>>, %arg4: memref<64x128xf32, #tpu.memory_space<vmem>>, %arg5: memref<32x128xf32, #tpu.memory_space<vmem>>) attributes {dimension_semantics = [#tpu.dimension_semantics<parallel>], iteration_bounds = array<i64: 1>, scalar_prefetch = 0 : i64, scratch_operands = 0 : i64, tpu.core_type = #tpu.core_type<tc>, window_params = [{transform_indices = @transform_0, window_bounds = array<i64: 32, 128>}, {transform_indices = @transform_1, window_bounds = array<i64: 32, 64>}, {pipeline_mode = #tpu.pipeline_mode<synchronous>, transform_indices = @transform_2, window_bounds = array<i64: 128, 128>}, {pipeline_mode = #tpu.pipeline_mode<synchronous>, transform_indices = @transform_3, window_bounds = array<i64: 64, 128>}, {transform_indices = @transform_4, window_bounds = array<i64: 32, 128>}]} {
    %c0 = arith.constant 0 : index
    %c0_0 = arith.constant 0 : index
    %0 = vector.load %arg1[%c0, %c0_0] : memref<32x128xf32, #tpu.memory_space<vmem>>, vector<32x128xf32>
    %c0_1 = arith.constant 0 : index
    %c0_2 = arith.constant 0 : index
    %1 = vector.load %arg3[%c0_1, %c0_2] : memref<128x128xf32, #tpu.memory_space<vmem>>, vector<128x128xf32>
    %cst = arith.constant dense<0.000000e+00> : vector<32x128xf32>
    %2 = tpu.matmul %0, %1, %cst {dimension_numbers = #tpu.dot_dimension_numbers<[1], [0], [0], [1], [0, 0, 1, 1], [], []>} : vector<32x128xf32>, vector<128x128xf32>, vector<32x128xf32> -> vector<32x128xf32>
    %c0_3 = arith.constant 0 : index
    %c0_4 = arith.constant 0 : index
    %3 = vector.load %arg2[%c0_3, %c0_4] : memref<32x64xf32, #tpu.memory_space<vmem>>, vector<32x64xf32>
    %c0_5 = arith.constant 0 : index
    %c0_6 = arith.constant 0 : index
    %4 = vector.load %arg4[%c0_5, %c0_6] : memref<64x128xf32, #tpu.memory_space<vmem>>, vector<64x128xf32>
    %cst_7 = arith.constant dense<0.000000e+00> : vector<32x128xf32>
    %5 = tpu.matmul %3, %4, %cst_7 {dimension_numbers = #tpu.dot_dimension_numbers<[1], [0], [0], [1], [0, 0, 1, 1], [], []>} : vector<32x64xf32>, vector<64x128xf32>, vector<32x128xf32> -> vector<32x128xf32>
    %6 = arith.addf %2, %5 : vector<32x128xf32>
    %c0_8 = arith.constant 0 : index
    %c0_9 = arith.constant 0 : index
    %7 = vector.load %arg5[%c0_8, %c0_9] : memref<32x128xf32, #tpu.memory_space<vmem>>, vector<32x128xf32>
    tpu.vector_store %arg5[%c0_8, %c0_9], %6 {strides = array<i32>} : memref<32x128xf32, #tpu.memory_space<vmem>>, vector<32x128xf32>,
    return
  }
  func.func @transform_0(%arg0: i32) -> (i32, i32) {
    %c0_i32 = arith.constant 0 : i32
    %c0_i32_0 = arith.constant 0 : i32
    return %arg0, %c0_i32 : i32, i32
  }
  func.func @transform_1(%arg0: i32) -> (i32, i32) {
    %c0_i32 = arith.constant 0 : i32
    %c0_i32_0 = arith.constant 0 : i32
    return %arg0, %c0_i32 : i32, i32
  }
  func.func @transform_2(%arg0: i32) -> (i32, i32) {
    %c0_i32 = arith.constant 0 : i32
    %c0_i32_0 = arith.constant 0 : i32
    %c0_i32_1 = arith.constant 0 : i32
    return %c0_i32, %c0_i32_0 : i32, i32
  }
  func.func @transform_3(%arg0: i32) -> (i32, i32) {
    %c0_i32 = arith.constant 0 : i32
    %c0_i32_0 = arith.constant 0 : i32
    %c0_i32_1 = arith.constant 0 : i32
    return %c0_i32, %c0_i32_0 : i32, i32
  }
  func.func @transform_4(%arg0: i32) -> (i32, i32) {
    %c0_i32 = arith.constant 0 : i32
    %c0_i32_0 = arith.constant 0 : i32
    return %arg0, %c0_i32 : i32, i32
  }
}

</mosaic_0001>

<bundles_post_ra>
// kernel: tpu_custom_call.1
= control target key start
LH: loop header
LB: loop body
LE: loop exit
PB: predicated region body
PF: predicated region fallthrough
CT: control target
= control target key end

     0   :  { %9 = vsyncpa [#allocation3], 0  ;;  %s709_s0 = inlined_call_operand.hbm [shape: f32[32,128], index: 0, kind: input, shape index: {}]   ;;  %s710_s1 = inlined_call_operand.hbm [shape: f32[32,64], index: 1, kind: input, shape index: {}]   ;;  %s711_s2 = inlined_call_operand.hbm [shape: f32[128,128], index: 2, kind: input, shape index: {}]   ;;  %s712_s3 = inlined_call_operand.hbm [shape: f32[64,128], index: 3, kind: input, shape index: {}]   ;;  %s713_s4 = inlined_call_operand.hbm [shape: f32[32,128], index: 4, kind: output, shape index: {}]  }
   0x1   :  { %10 = vsyncpa [#allocation6], 0 }
   0x2   :  { %11 = vsyncpa [#allocation9], 0 }
   0x3   :  { %12 = vsyncpa [#allocation4], 0  ;;  %s584_s15 = smov [#allocation5]   ;;  %s585_s17 = smov [#allocation2]  }
   0x4   :  { %s30_s16 = sshll.u32 %s584_s15, 4  ;;  %s18_s18 = sshll.u32 %s585_s17, 4  ;;  %s31_s16 = int_to_ptr.vmem [resolvable:$true] %s30_s16  ;;  %s616_s18 = int_to_ptr.vmem [resolvable:$true] %s18_s18 }
   0x5   :  { %s466_s21 = scalar_lea.hbm %s710_s1, 512 }
   0x6   :  { %p467_p0 = scmp.ne.s32.totalorder %s710_s1, %s466_s21  ;;  %p470_p1 = scmp.lt.u32.totalorder %s466_s21, %s710_s1 }
   0x8   :  { %p472_p2 = pnand %p470_p1, %p467_p0 }
   0xa   :  { %475 = shalt.err (!%p472_p2)
}
   0xb   :  { %s476_s26 = scalar_lea.vmem %s31_s16, 512  ;;  %p481_p4 = scmp.lt.s32.totalorder %s31_s16, %s31_s16 }
   0xc   :  { %p477_p3 = scmp.ne.s32.totalorder %s31_s16, %s476_s26  ;;  %p482_p5 = scmp.lt.s32.totalorder %s476_s26, %s476_s26 }
   0xe   :  { %p483_p6 = por %p482_p5, %p481_p4 }
  0x10   :  { %p484_p7 = pnand %p483_p6, %p477_p3 }
  0x12   :  { %487 = shalt.err (!%p484_p7)
}
  0x13   :  { %s586_s27 = smov 128   ;;  %s587_s28 = smov 8  }
  0x14   :  { %36 = dma.hbm_to_vmem [thread:$0]  %s710_s1, 512, %s31_s16, [#allocation6], %s586_s27, %s586_s27, %s587_s28  }
  0x15   :  { %s488_s7 = scalar_lea.hbm %s709_s0, 512 }
  0x16   :  { %p489_p8 = scmp.ne.s32.totalorder %s709_s0, %s488_s7  ;;  %p492_p9 = scmp.lt.u32.totalorder %s488_s7, %s709_s0 }
  0x18   :  { %p494_p10 = pnand %p492_p9, %p489_p8 }
  0x1a   :  { %497 = shalt.err (!%p494_p10)
}
  0x1b   :  { %s498_s12 = scalar_lea.vmem %s616_s18, 512  ;;  %p503_p12 = scmp.lt.s32.totalorder %s616_s18, %s616_s18 }
  0x1c   :  { %p499_p11 = scmp.ne.s32.totalorder %s616_s18, %s498_s12  ;;  %p504_p13 = scmp.lt.s32.totalorder %s498_s12, %s498_s12 }
  0x1e   :  { %p505_p0 = por %p504_p13, %p503_p12 }
  0x20   :  { %p506_p1 = pnand %p505_p0, %p499_p11 }
  0x22   :  { %509 = shalt.err (!%p506_p1)
}
  0x23   :  { %24 = dma.hbm_to_vmem [thread:$0]  %s709_s0, 512, %s616_s18, [#allocation3], %s586_s27, %s586_s27, %s587_s28  }
  0x24   :  { %s588_s14 = smov [#allocation7]   ;;  %s589_s16 = smov [#allocation8]  }
  0x25   :  { %s42_s15 = sshll.u32 %s588_s14, 4  ;;  %s54_s17 = sshll.u32 %s589_s16, 4  ;;  %s43_s15 = int_to_ptr.vmem [resolvable:$true] %s42_s15  ;;  %s653_s17 = int_to_ptr.vmem [resolvable:$true] %s54_s17 }
  0x26   :  { %s510_s21 = scalar_lea.hbm %s711_s2, 2048 }
  0x27   :  { %p511_p2 = scmp.ne.s32.totalorder %s711_s2, %s510_s21  ;;  %p514_p3 = scmp.lt.u32.totalorder %s510_s21, %s711_s2 }
  0x29   :  { %p516_p4 = pnand %p514_p3, %p511_p2 }
  0x2b   :  { %519 = shalt.err (!%p516_p4)
}
  0x2c   :  { %s520_s0 = scalar_lea.vmem %s43_s15, 2048  ;;  %p525_p6 = scmp.lt.s32.totalorder %s43_s15, %s43_s15 }
  0x2d   :  { %p521_p5 = scmp.ne.s32.totalorder %s43_s15, %s520_s0  ;;  %p526_p7 = scmp.lt.s32.totalorder %s520_s0, %s520_s0 }
  0x2f   :  { %p527_p8 = por %p526_p7, %p525_p6 }
  0x31   :  { %p528_p9 = pnand %p527_p8, %p521_p5 }
  0x33   :  { %531 = shalt.err (!%p528_p9)
}
  0x34   :  { %48 = dma.hbm_to_vmem [thread:$0]  %s711_s2, 2048, %s43_s15, [#allocation6], %s586_s27, %s586_s27, %s587_s28  }
  0x35   :  { %s532_s5 = scalar_lea.hbm %s712_s3, 1024 }
  0x36   :  { %p533_p10 = scmp.ne.s32.totalorder %s712_s3, %s532_s5  ;;  %p536_p11 = scmp.lt.u32.totalorder %s532_s5, %s712_s3 }
  0x38   :  { %p538_p12 = pnand %p536_p11, %p533_p10 }
  0x3a   :  { %541 = shalt.err (!%p538_p12)
}
  0x3b   :  { %s542_s10 = scalar_lea.vmem %s653_s17, 1024  ;;  %p547_p0 = scmp.lt.s32.totalorder %s653_s17, %s653_s17 }
  0x3c   :  { %p543_p13 = scmp.ne.s32.totalorder %s653_s17, %s542_s10  ;;  %p548_p1 = scmp.lt.s32.totalorder %s542_s10, %s542_s10 }
  0x3e   :  { %p549_p2 = por %p548_p1, %p547_p0 }
  0x40   :  { %p550_p3 = pnand %p549_p2, %p543_p13 }
  0x42   :  { %553 = shalt.err (!%p550_p3)
}
  0x43   :  { %60 = dma.hbm_to_vmem [thread:$0]  %s712_s3, 1024, %s653_s17, [#allocation9], %s586_s27, %s586_s27, %s587_s28  }
  0x44   :  { %576 = dma.done.wait [#allocation3], 512  }
  0x45   :  { %577 = vsyncadd [#allocation3], 4294966784 }
  0x46   :  { %578 = dma.done.wait [#allocation6], 2560  }
  0x47   :  { %579 = vsyncadd [#allocation6], 4294964736 }
  0x48   :  { %580 = dma.done.wait [#allocation9], 1024  }
  0x49   :  { %581 = vsyncadd [#allocation9], 4294966272  ;;  %v77_v0 = vld [vmem:[#allocation7] sm:$0xff]  ;;  %v78_v1 = vld [vmem:[#allocation7 + $0x8] sm:$0xff]  ;;  %vm105_vm0 = vcmask 523264   ;;  %s590_s3 = smov [#allocation10]  }
  0x4a   :  { %v79_v2 = vld [vmem:[#allocation7 + $0x10] sm:$0xff]  ;;  %v423_v3 = vpack.c.bf16 %v78_v1, %v77_v0  ;;  %v80_v4 = vld [vmem:[#allocation7 + $0x18] sm:$0xff]  ;;  %v81_v6 = vld [vmem:[#allocation7 + $0x20] sm:$0xff]  ;;  %s297_s12 = sshll.u32 %s590_s3, 4  ;;  %s298_s12 = int_to_ptr.vmem [resolvable:$true] %s297_s12 }
  0x4b   :  { %v427_v5 = vpack.c.bf16 %v80_v4, %v79_v2  ;;  %v82_v7 = vld [vmem:[#allocation7 + $0x28] sm:$0xff]  ;;  %v97_v8 = vld [vmem:[#allocation8] sm:$0xff]  ;;  %v99_v11 = vld [vmem:[#allocation8 + $0x10] sm:$0xff]  ;;  %s554_s1 = scalar_lea.vmem %s298_s12, 512  ;;  %p559_p5 = scmp.lt.s32.totalorder %s298_s12, %s298_s12 }
  0x4c   :  { %424 = vmatprep.subr.bf16.mxu0 %v423_v3  ;;  %v98_v9 = vld [vmem:[#allocation8 + $0x8] sm:$0xff]  ;;  %v100_v12 = vld [vmem:[#allocation8 + $0x18] sm:$0xff]  ;;  %v431_v13 = vpack.c.bf16 %v82_v7, %v81_v6  ;;  %v101_v15 = vld [vmem:[#allocation8 + $0x20] sm:$0xff]  ;;  %p555_p4 = scmp.ne.s32.totalorder %s298_s12, %s554_s1  ;;  %p560_p6 = scmp.lt.s32.totalorder %s554_s1, %s554_s1 }
  0x4d   :  { %426 = vmatpush3.bf16.msra.mxu0 %v423_v3  ;;  %v407_v10 = vpack.c.bf16 %v98_v9, %v97_v8  ;;  %v411_v14 = vpack.c.bf16 %v100_v12, %v99_v11  ;;  %v102_v16 = vld [vmem:[#allocation8 + $0x28] sm:$0xff]  ;;  %v83_v17 = vld [vmem:[#allocation7 + $0x30] sm:$0xff]  ;;  %v84_v18 = vld [vmem:[#allocation7 + $0x38] sm:$0xff] }
  0x4e   :  { %428 = vmatprep.subr.bf16.mxu0 %v427_v5  ;;  %v415_v19 = vpack.c.bf16 %v102_v16, %v101_v15  ;;  %v93_v20 = vld [vmem:[#allocation5] sm:$0xff]  ;;  %v435_v22 = vpack.c.bf16 %v84_v18, %v83_v17  ;;  %v103_v23 = vld [vmem:[#allocation8 + $0x30] sm:$0xff]  ;;  %v104_v24 = vld [vmem:[#allocation8 + $0x38] sm:$0xff]  ;;  %p561_p7 = por %p560_p6, %p559_p5 }
  0x4f   :  { %408 = vmatprep.subr.bf16.mxu1 %v407_v10  ;;  %v73_v21 = vld [vmem:[#allocation2] sm:$0xff]  ;;  %363 = vmatprep.mubr.msk.f32.mxu1 %vm105_vm0, %v93_v20  ;;  %v86_v26 = vld [vmem:[#allocation7 + $0x48] sm:$0xff]  ;;  %v419_v27 = vpack.c.bf16 %v104_v24, %v103_v23  ;;  %v87_v29 = vld [vmem:[#allocation7 + $0x50] sm:$0xff] }
  0x50   :  { %410 = vmatpush3.bf16.msra.mxu1 %v407_v10  ;;  %v85_v25 = vld [vmem:[#allocation7 + $0x40] sm:$0xff]  ;;  %401 = vmatprep.mubr.f32.mxu0 %v73_v21  ;;  %v88_v30 = vld [vmem:[#allocation7 + $0x58] sm:$0xff]  ;;  %v90_v33 = vld [vmem:[#allocation7 + $0x68] sm:$0xff]  ;;  %p562_p8 = pnand %p561_p7, %p555_p4 }
  0x51   :  { %430 = vmatpush3.bf16.msra.mxu0 %v427_v5  ;;  %412 = vmatprep.subr.bf16.mxu1 %v411_v14  ;;  %v439_v28 = vpack.c.bf16 %v86_v26, %v85_v25  ;;  %v443_v31 = vpack.c.bf16 %v88_v30, %v87_v29  ;;  %v89_v32 = vld [vmem:[#allocation7 + $0x60] sm:$0xff]  ;;  %v94_v34 = vld [vmem:[#allocation5 + $0x8] sm:$0xff]  ;;  %v95_v35 = vld [vmem:[#allocation5 + $0x10] sm:$0xff] }
  0x52   :  { %432 = vmatprep.subr.bf16.mxu0 %v431_v13  ;;  %v447_v36 = vpack.c.bf16 %v90_v33, %v89_v32  ;;  %v91_v37 = vld [vmem:[#allocation7 + $0x70] sm:$0xff]  ;;  %v92_v38 = vld [vmem:[#allocation7 + $0x78] sm:$0xff]  ;;  %v74_v41 = vld [vmem:[#allocation2 + $0x8] sm:$0xff] }
  0x53   :  { %v96_v39 = vld [vmem:[#allocation5 + $0x18] sm:$0xff]  ;;  %v451_v40 = vpack.c.bf16 %v92_v38, %v91_v37  ;;  %v75_v42 = vld [vmem:[#allocation2 + $0x10] sm:$0xff] }
  0x54   :  { %414 = vmatpush3.bf16.msra.mxu1 %v411_v14  ;;  %v76_v43 = vld [vmem:[#allocation2 + $0x18] sm:$0xff] }
  0x55   :  { %434 = vmatpush3.bf16.msra.mxu0 %v431_v13  ;;  %416 = vmatprep.subr.bf16.mxu1 %v415_v19 }
  0x56   :  { %436 = vmatprep.subr.bf16.mxu0 %v435_v22 }
  0x58   :  { %418 = vmatpush3.bf16.msra.mxu1 %v415_v19 }
  0x59   :  { %438 = vmatpush3.bf16.msra.mxu0 %v435_v22  ;;  %420 = vmatprep.subr.bf16.mxu1 %v419_v27 }
  0x5a   :  { %440 = vmatprep.subr.bf16.mxu0 %v439_v28 }
  0x5c   :  { %422 = vmatpush3.bf16.msra.mxu1 %v419_v27 }
  0x5d   :  { %442 = vmatpush3.bf16.msra.mxu0 %v439_v28 }
  0x5e   :  { %444 = vmatprep.subr.bf16.mxu0 %v443_v31 }
  0x5f   :  { %364 = vmatmul.mubr.msk.f32.vlgmr.msra.gmra.mrb[0].mxu1 %vm105_vm0, %v94_v34 }
  0x60   :  { %366 = vmatprep.mubr.msk.f32.mxu1 %vm105_vm0, %v95_v35 }
  0x61   :  { %446 = vmatpush3.bf16.msra.mxu0 %v443_v31 }
  0x62   :  { %448 = vmatprep.subr.bf16.mxu0 %v447_v36 }
  0x63   :  { %367 = vmatmul.mubr.msk.f32.gmra.mrb[2].mxu1 %vm105_vm0, %v96_v39 }
  0x65   :  { %450 = vmatpush3.bf16.msra.mxu0 %v447_v36 }
  0x66   :  { %452 = vmatprep.subr.bf16.mxu0 %v451_v40 }
  0x69   :  { %454 = vmatpush3.bf16.msra.mxu0 %v451_v40 }
  0x6c   :  { %402 = vmatmul.mubr.f32.vlgmr.msra.gmra.mrb[0].mxu0 %v74_v41 }
  0x6d   :  { %404 = vmatprep.mubr.f32.mxu0 %v75_v42 }
  0x70   :  { %405 = vmatmul.mubr.f32.gmra.mrb[2].mxu0 %v76_v43 }
 0x132   :  { %v365_v44 = vpop.f32.mrb[0].mxu1 }
 0x133   :  { %v184_v45 = vpop.f32.mrb[1].mxu1 }
 0x136   :  { %v368_v46 = vpop.f32.mrb[2].mxu1 }
 0x137   :  { %v194_v47 = vpop.f32.mrb[3].mxu1 }
 0x13f   :  { %v403_v48 = vpop.f32.mrb[0].mxu0 }
 0x140   :  { %v275_v49 = vadd.f32 %v403_v48, %v365_v44  ;;  %v269_v50 = vpop.f32.mrb[1].mxu0 }
 0x141   :  { %v270_v51 = vadd.f32 %v269_v50, %v184_v45 }
 0x142   :  { %289 = vst [vmem:[#allocation10 + $0x8] sm:$0xff] %v275_v49 }
 0x143   :  { %288 = vst [vmem:[#allocation10] sm:$0xff] %v270_v51  ;;  %v406_v52 = vpop.f32.mrb[2].mxu0 }
 0x144   :  { %v285_v53 = vadd.f32 %v406_v52, %v368_v46  ;;  %v279_v54 = vpop.f32.mrb[3].mxu0 }
 0x145   :  { %v280_v55 = vadd.f32 %v279_v54, %v194_v47 }
 0x146   :  { %291 = vst [vmem:[#allocation10 + $0x18] sm:$0xff] %v285_v53 }
 0x147   :  { %290 = vst [vmem:[#allocation10 + $0x10] sm:$0xff] %v280_v55 }
 0x148   :  { %565 = shalt.err (!%p562_p8)
}
 0x149   :  { %s566_s15 = scalar_lea.hbm %s713_s4, 512 }
 0x14a   :  { %p567_p9 = scmp.ne.s32.totalorder %s713_s4, %s566_s15  ;;  %p570_p10 = scmp.lt.u32.totalorder %s566_s15, %s713_s4 }
 0x14c   :  { %p572_p11 = pnand %p570_p10, %p567_p9 }
 0x14e   :  { %575 = shalt.err (!%p572_p11)
}
 0x14f   :  { %303 = dma.vmem_to_hbm [thread:$0]  %s298_s12, 512, %s713_s4, [#allocation4], %s586_s27, %s586_s27, %s587_s28  }
 0x150   :  { %582 = dma.done.wait [#allocation4], 512  }
 0x151   :  { %583 = vsyncadd [#allocation4], 4294966784 }
 0x152   :  { %307 = vsyncpa [#allocation3], 1 }
 0x153   :  { %308 = vsyncpa [#allocation6], 1 }
 0x154   :  { %309 = vsyncpa [#allocation9], 1 }
 0x155   :  { %310 = vsyncpa [#allocation4], 1 }

</bundles_post_ra>
